<compile_context>
chip_gen: v5e
topology: v5e:2x2
jax: 0.10.0
libtpu: 0.0.40
codegen_flags: <defaults>
</compile_context>

<pallas_src>
import jax
import jax.numpy as jnp
import numpy as np
from jax.experimental import pallas as pl
from jax.experimental.pallas import tpu as pltpu


def _make_kernel(h: int, w: int):
    l = h * w

    def kernel(edge_ref, x_ref, o_ref):
        # x_ref/o_ref: (block_planes, H*W); each row is one (n, c) plane
        # flattened row-major, so lane index = hh*W + ww.
        x = x_ref[...]
        m = x

        if w > 1:
            # Right neighbour with replicate pad: out[i] = x[i + 1], except at
            # the last column of each plane row where out[i] = x[i].
            last_col = jnp.broadcast_to(edge_ref[0:1, :], x.shape) != 0
            r = pltpu.roll(x, shift=l - 1, axis=1)        # out[i] = x[(i + 1) % l]
            r = jnp.where(last_col, x, r)                  # fix wrap at col W-1
            m = jnp.maximum(x, r)

        if h > 1:
            # Bottom neighbour with replicate pad: out[i] = m[i + W], except on
            # the last row of the plane where out[i] = m[i].
            last_row = jnp.broadcast_to(edge_ref[1:2, :], x.shape) != 0
            d = pltpu.roll(m, shift=(h - 1) * w, axis=1)   # out[i] = m[(i + W) % l]
            d = jnp.where(last_row, m, d)                  # fix wrap at row H-1
            m = jnp.maximum(m, d)

        o_ref[...] = m

    return kernel


def _choose_block_planes(num_planes: int, plane_bytes: int,
                         target_bytes: int = 2 * 1024 * 1024) -> int:
    """Planes per grid step: ~target_bytes per input block, sublane-aligned."""
    bp = max(1, target_bytes // max(1, plane_bytes))
    if bp >= num_planes:
        return num_planes            # full leading dim is always a legal block
    bp = max(8, (bp // 8) * 8)       # keep 2nd-minor block dim a multiple of 8
    return min(bp, num_planes)


def max_pool_stride1(x):
    """Equivalent of F.max_pool2d(F.pad(x, (0,1,0,1), mode='replicate'), 2, stride=1).

    Args:
      x: (N, C, H, W) array.
    Returns:
      (N, C, H, W) array, same dtype as x.
    """
    n, c, h, w = x.shape
    p = n * c
    l = h * w
    itemsize = jnp.dtype(x.dtype).itemsize

    # Lane-dense view: each (n, c) plane becomes one row of length H*W.
    x2 = x.reshape(p, l)

    # Host-precomputed per-lane edge masks:
    #   row 0: lane is in the last column (ww == W-1) of its plane,
    #   row 1: lane is in the last row    (hh == H-1) of its plane.
    lane = np.arange(l)
    edge = jnp.asarray(
        np.stack([(lane % w) == (w - 1), lane >= (h - 1) * w]).astype(np.int32))

    bp = _choose_block_planes(p, l * itemsize)
    grid = (pl.cdiv(p, bp),)

    # TODO(synk): for very large single planes (H*W*itemsize >> 2 MiB) tile
    # along H with a 1-row halo instead of whole planes per block, to keep the
    # VMEM footprint bounded on v7x.

    out2 = pl.pallas_call(
        _make_kernel(h, w),
        out_shape=jax.ShapeDtypeStruct((p, l), x.dtype),
        grid_spec=pltpu.PrefetchScalarGridSpec(
            num_scalar_prefetch=0,
            grid=grid,
            in_specs=[
                pl.BlockSpec((2, l), lambda i: (0, 0)),     # edge masks (tiny)
                pl.BlockSpec((bp, l), lambda i: (i, 0)),    # input planes
            ],
            out_specs=pl.BlockSpec((bp, l), lambda i: (i, 0)),
        ),
        compiler_params=pltpu.CompilerParams(
            dimension_semantics=("parallel",),
        ),
        cost_estimate=pl.CostEstimate(
            flops=3 * x.size,
            transcendentals=0,
            bytes_accessed=2 * x.size * itemsize + 2 * l * 4,
        ),
    )(edge, x2)

    return out2.reshape(n, c, h, w)


def _reference(x):
    # Pure-JAX reference (replicate pad + 2x2 max, stride 1).
    xp = jnp.pad(x, ((0, 0), (0, 0), (0, 1), (0, 1)), mode="edge")
    return jnp.maximum(
        jnp.maximum(xp[:, :, :-1, :-1], xp[:, :, :-1, 1:]),
        jnp.maximum(xp[:, :, 1:, :-1], xp[:, :, 1:, 1:]),
    )


if __name__ == "__main__":
    key = jax.random.PRNGKey(0)
    x = jax.random.normal(key, (2, 4, 16, 16), dtype=jnp.float32)

    out = jax.block_until_ready(max_pool_stride1(x))

    ref = _reference(x)
    assert out.shape == x.shape and out.dtype == x.dtype
    assert jnp.allclose(out, ref), "Pallas output mismatch vs reference"

    print("KERNEL_OK")
</pallas_src>

<mosaic_0001>
module attributes {stable_mosaic.version = 11 : i64} {
  func.func @kernel(%arg0: i32, %arg1: memref<2x256xi32, #tpu.memory_space<vmem>>, %arg2: memref<8x256xf32, #tpu.memory_space<vmem>>, %arg3: memref<8x256xf32, #tpu.memory_space<vmem>>) attributes {dimension_semantics = [#tpu.dimension_semantics<parallel>], iteration_bounds = array<i64: 1>, scalar_prefetch = 0 : i64, scratch_operands = 0 : i64, tpu.core_type = #tpu.core_type<tc>, window_params = [{pipeline_mode = #tpu.pipeline_mode<synchronous>, transform_indices = @transform_0, window_bounds = array<i64: 2, 256>}, {transform_indices = @transform_1, window_bounds = array<i64: 8, 256>}, {transform_indices = @transform_2, window_bounds = array<i64: 8, 256>}]} {
    %c0 = arith.constant 0 : index
    %c0_0 = arith.constant 0 : index
    %0 = vector.load %arg2[%c0, %c0_0] : memref<8x256xf32, #tpu.memory_space<vmem>>, vector<8x256xf32>
    %c0_1 = arith.constant 0 : index
    %c0_2 = arith.constant 0 : index
    %1 = vector.load %arg1[%c0_1, %c0_2] : memref<2x256xi32, #tpu.memory_space<vmem>>, vector<1x256xi32>
    %2 = vector.shape_cast %1 : vector<1x256xi32> to vector<1x256xi32>
    %3 = vector.broadcast %2 : vector<1x256xi32> to vector<8x256xi32>
    %c0_i32 = arith.constant 0 : i32
    %4 = vector.broadcast %c0_i32 : i32 to vector<8x256xi32>
    %5 = arith.cmpi ne, %3, %4 : vector<8x256xi32>
    %c255_i32 = arith.constant 255 : i32
    %6 = tpu.dynamic_rotate %0 by %c255_i32 dim 1 : vector<8x256xf32>, i32 -> vector<8x256xf32>
    %7 = arith.select %5, %0, %6 : vector<8x256xi1>, vector<8x256xf32>
    %8 = arith.maximumf %0, %7 : vector<8x256xf32>
    %c1 = arith.constant 1 : index
    %c0_3 = arith.constant 0 : index
    %9 = vector.load %arg1[%c1, %c0_3] : memref<2x256xi32, #tpu.memory_space<vmem>>, vector<1x256xi32>
    %10 = vector.shape_cast %9 : vector<1x256xi32> to vector<1x256xi32>
    %11 = vector.broadcast %10 : vector<1x256xi32> to vector<8x256xi32>
    %c0_i32_4 = arith.constant 0 : i32
    %12 = vector.broadcast %c0_i32_4 : i32 to vector<8x256xi32>
    %13 = arith.cmpi ne, %11, %12 : vector<8x256xi32>
    %c240_i32 = arith.constant 240 : i32
    %14 = tpu.dynamic_rotate %8 by %c240_i32 dim 1 : vector<8x256xf32>, i32 -> vector<8x256xf32>
    %15 = arith.select %13, %8, %14 : vector<8x256xi1>, vector<8x256xf32>
    %16 = arith.maximumf %8, %15 : vector<8x256xf32>
    %c0_5 = arith.constant 0 : index
    %c0_6 = arith.constant 0 : index
    %17 = vector.load %arg3[%c0_5, %c0_6] : memref<8x256xf32, #tpu.memory_space<vmem>>, vector<8x256xf32>
    tpu.vector_store %arg3[%c0_5, %c0_6], %16 {strides = array<i32>} : memref<8x256xf32, #tpu.memory_space<vmem>>, vector<8x256xf32>,
    return
  }
  func.func @transform_0(%arg0: i32) -> (i32, i32) {
    %c0_i32 = arith.constant 0 : i32
    %c0_i32_0 = arith.constant 0 : i32
    %c0_i32_1 = arith.constant 0 : i32
    return %c0_i32, %c0_i32_0 : i32, i32
  }
  func.func @transform_1(%arg0: i32) -> (i32, i32) {
    %c0_i32 = arith.constant 0 : i32
    %c0_i32_0 = arith.constant 0 : i32
    return %arg0, %c0_i32 : i32, i32
  }
  func.func @transform_2(%arg0: i32) -> (i32, i32) {
    %c0_i32 = arith.constant 0 : i32
    %c0_i32_0 = arith.constant 0 : i32
    return %arg0, %c0_i32 : i32, i32
  }
}

</mosaic_0001>

<bundles_post_ra>
// kernel: tpu_custom_call.1
= control target key start
LH: loop header
LB: loop body
LE: loop exit
PB: predicated region body
PF: predicated region fallthrough
CT: control target
= control target key end

     0   :  { %7 = vsyncpa [#allocation3], 0  ;;  %s209_s0 = inlined_call_operand.hbm [shape: s32[2,256], index: 0, kind: input, shape index: {}]   ;;  %s210_s1 = inlined_call_operand.hbm [shape: f32[8,256], index: 1, kind: input, shape index: {}]   ;;  %s211_s2 = inlined_call_operand.hbm [shape: f32[8,256], index: 2, kind: output, shape index: {}]  }
   0x1   :  { %8 = vsyncpa [#allocation6], 0 }
   0x2   :  { %9 = vsyncpa [#allocation4], 0  ;;  %s15_s11 = sshll.u32 %s209_s0, 4  ;;  %s180_s12 = smov [#allocation2]   ;;  %s16_s11 = int_to_ptr.hbm [resolvable:$true] %s15_s11 }
   0x3   :  { %s17_s13 = sshll.u32 %s180_s12, 4  ;;  %s26_s16 = sshll.u32 %s210_s1, 4  ;;  %s18_s13 = int_to_ptr.vmem [resolvable:$true] %s17_s13  ;;  %s27_s16 = int_to_ptr.hbm [resolvable:$true] %s26_s16 }
   0x4   :  { %20 = dma.hbm_to_vmem [thread:$0]  %s16_s11, 64, %s18_s13, [#allocation3]  }
   0x5   :  { %s181_s17 = smov [#allocation5]  }
   0x6   :  { %s28_s18 = sshll.u32 %s181_s17, 4  ;;  %s29_s18 = int_to_ptr.vmem [resolvable:$true] %s28_s18 }
   0x7   :  { %31 = dma.hbm_to_vmem [thread:$0]  %s27_s16, 256, %s29_s18, [#allocation6]  }
   0x8   :  { %174 = dma.done.wait [#allocation3], 64  }
   0x9   :  { %175 = vsyncadd [#allocation3], 4294967232 }
   0xa   :  { %176 = dma.done.wait [#allocation6], 256  }
   0xb   :  { %177 = vsyncadd [#allocation6], 4294967040  ;;  %v40_v0 = vld [vmem:[#allocation5] sm:$0xff]  ;;  %s182_s0 = smov 127   ;;  %v41_v1 = vld [vmem:[#allocation5 + $0x8] sm:$0xff]  ;;  %v51_v2 = vlaneseq  ;;  %s183_s1 = smov 112  }
   0xc   :  { %47 = vrot.lane.b32.xlu0 %v40_v0, %s182_s0  ;;  %v42_v4 = vld [vmem:[#allocation2] ss:$2 sm:$0x3]  ;;  %v61_v16 = vld [vmem:[#allocation2 + $0x1] ss:$2 sm:$0x3] }
   0xd   :  { %v52_v5 = vand.u32 127, %v51_v2  ;;  %v43_v6 = vperm.slane %v42_v4, 0  ;;  %v44_v8 = vperm.slane %v42_v4, 1  ;;  %v62_v17 = vperm.slane %v61_v16, 0  ;;  %s184_s19 = smov [#allocation7]   ;;  %s86_s23 = sshll.u32 %s211_s2, 4  ;;  %s87_s23 = int_to_ptr.hbm [resolvable:$true] %s86_s23 }
   0xe   :  { %v63_v18 = vperm.slane %v61_v16, 1  ;;  %s84_s20 = sshll.u32 %s184_s19, 4  ;;  %s85_s20 = int_to_ptr.vmem [resolvable:$true] %s84_s20 }
   0xf   :  { %vm53_vm0 = vcmp.lt.s32.totalorder %v52_v5, 127  ;;  %vm45_vm1 = vcmp.ne.s32.totalorder %v43_v6, 0  ;;  %vm46_vm2 = vcmp.ne.s32.totalorder %v44_v8, 0  ;;  %vm70_vm3 = vcmp.lt.s32.totalorder %v52_v5, 112 }
  0x10   :  { %vm64_vm4 = vcmp.ne.s32.totalorder %v62_v17, 0  ;;  %vm65_vm5 = vcmp.ne.s32.totalorder %v63_v18, 0 }
  0x14   :  { %49 = vrot.lane.b32.xlu0 %v41_v1, %s182_s0 }
  0x7e   :  { %v48_v3 = vpop.permute.xlu0 %47 }
  0x86   :  { %v50_v7 = vpop.permute.xlu0 %49 }
  0x87   :  { %v54_v9 = vsel %vm53_vm0, %v48_v3, %v50_v7  ;;  %v55_v12 = vsel %vm53_vm0, %v50_v7, %v48_v3 }
  0x88   :  { %v56_v10 = vsel %vm45_vm1, %v40_v0, %v54_v9  ;;  %v57_v13 = vsel %vm46_vm2, %v41_v1, %v55_v12 }
  0x89   :  { %v58_v11 = vmax.f32 %v40_v0, %v56_v10  ;;  %v59_v14 = vmax.f32 %v41_v1, %v57_v13 }
  0x8b   :  { %66 = vrot.lane.b32.xlu1 %v58_v11, %s183_s1 }
  0x93   :  { %68 = vrot.lane.b32.xlu1 %v59_v14, %s183_s1 }
  0xfd   :  { %v67_v15 = vpop.permute.xlu1 %66 }
 0x105   :  { %v69_v19 = vpop.permute.xlu1 %68 }
 0x106   :  { %v71_v20 = vsel %vm70_vm3, %v67_v15, %v69_v19  ;;  %v72_v21 = vsel %vm70_vm3, %v69_v19, %v67_v15 }
 0x107   :  { %v73_v22 = vsel %vm64_vm4, %v58_v11, %v71_v20  ;;  %v74_v23 = vsel %vm65_vm5, %v59_v14, %v72_v21 }
 0x108   :  { %v75_v24 = vmax.f32 %v58_v11, %v73_v22  ;;  %v76_v25 = vmax.f32 %v59_v14, %v74_v23 }
 0x10a   :  { %77 = vst [vmem:[#allocation7] sm:$0xff] %v75_v24 }
 0x10b   :  { %78 = vst [vmem:[#allocation7 + $0x8] sm:$0xff] %v76_v25 }
 0x10c   :  { %89 = dma.vmem_to_hbm [thread:$0]  %s85_s20, 256, %s87_s23, [#allocation4]  }
 0x10d   :  { %178 = dma.done.wait [#allocation4], 256  }
 0x10e   :  { %179 = vsyncadd [#allocation4], 4294967040 }
 0x10f   :  { %94 = vsyncpa [#allocation3], 1 }
 0x110   :  { %95 = vsyncpa [#allocation6], 1 }
 0x111   :  { %96 = vsyncpa [#allocation4], 1 }

</bundles_post_ra>
